<compile_context>
chip_gen: v7x
topology: tpu7x:2x2x1
jax: 0.10.0
libtpu: 0.0.40
codegen_flags: <defaults>
</compile_context>

<pallas_src>
import functools

import jax
import jax.numpy as jnp
from jax.experimental import pallas as pl
from jax.experimental.pallas import tpu as pltpu


def _mbconv_kernel(x_ref, p1_ref, p3_ref, o_ref, *, Cin, hidden, H, W,
                   use_residual):
    """One image per grid step.

    x_ref : (Cin, H*W)   activation, flattened n = h*W + w (lane axis).
    p1_ref: (hidden,128)  packed [w1 | 3x3 taps | b1 | b2]  (BN scales folded).
    p3_ref: (Cout,  128)  packed [w3 | b3]                  (BN scales folded).
    """
    HW = H * W
    x = x_ref[...].astype(jnp.float32)                       # (Cin, HW)

    p1 = p1_ref[...]                                          # (hidden, 128)
    w1 = p1[:, 0:Cin]                                         # (hidden, Cin)
    wdw = p1[:, Cin:Cin + 9]                                  # (hidden, 9)
    b1 = p1[:, Cin + 9:Cin + 10]                              # (hidden, 1)
    b2 = p1[:, Cin + 10:Cin + 11]                             # (hidden, 1)

    # ---- expand: 1x1 conv (MXU) + bias + ReLU6 --------------------------
    h = jnp.dot(w1, x, preferred_element_type=jnp.float32) + b1
    h = jnp.clip(h, 0.0, 6.0)                                 # (hidden, HW)

    # ---- in-kernel boundary masks (no mask DMA) --------------------------
    idx = jax.lax.broadcasted_iota(jnp.int32, (1, HW), 1)     # lane index n
    if (W & (W - 1)) == 0:                                    # power of two: VPU and/shift
        col = jnp.bitwise_and(idx, W - 1)
        row = jnp.right_shift(idx, W.bit_length() - 1)
    else:
        col = idx % W
        row = idx // W

    # ---- depthwise 3x3 (stride 1, pad 1), separable roll form -------------
    # Horizontal: two +/-1 lane rolls, column-masked (wraps land on masked spots).
    h_l = jnp.where(col > 0, pltpu.roll(h, 1, axis=1), 0.0)        # value h[n-1]
    h_r = jnp.where(col < W - 1, pltpu.roll(h, HW - 1, axis=1), 0.0)  # value h[n+1]

    # Per-kernel-row weighted sums (VPU FMAs); tap k = (oy+1)*3 + (ox+1).
    rs0 = h_l * wdw[:, 0:1] + h * wdw[:, 1:2] + h_r * wdw[:, 2:3]   # oy = -1
    rs1 = h_l * wdw[:, 3:4] + h * wdw[:, 4:5] + h_r * wdw[:, 5:6]   # oy =  0
    rs2 = h_l * wdw[:, 6:7] + h * wdw[:, 7:8] + h_r * wdw[:, 8:9]   # oy = +1

    # Vertical: two +/-W rolls, row-masked; b2 folded into the accumulator init.
    acc = rs1 + b2
    acc = acc + jnp.where(row > 0, pltpu.roll(rs0, W, axis=1), 0.0)
    acc = acc + jnp.where(row < H - 1, pltpu.roll(rs2, HW - W, axis=1), 0.0)
    h2 = jnp.clip(acc, 0.0, 6.0)                              # (hidden, HW)

    # ---- project: 1x1 conv (MXU) + bias (no activation) -------------------
    p3 = p3_ref[...]                                          # (Cout, 128)
    w3 = p3[:, 0:hidden]                                      # (Cout, hidden)
    b3 = p3[:, hidden:hidden + 1]                             # (Cout, 1)
    y = jnp.dot(w3, h2, preferred_element_type=jnp.float32) + b3
    if use_residual:                                          # stride==1 and Cin==Cout
        y = y + x
    o_ref[...] = y.astype(o_ref.dtype)


def mbconv_forward(x_nchw, params, *, stride=1):
    """Runs MBConv on x_nchw (B, Cin, H, W); returns (B, Cout, H, W)."""
    # TODO(synk): stride=2 depthwise path not implemented (module default uses stride=1).
    assert stride == 1
    B, Cin, H, W = x_nchw.shape
    hidden = params["w1"].shape[1]
    Cout = params["w3"].shape[1]
    use_residual = (stride == 1) and (Cin == Cout)
    HW = H * W
    assert HW % 128 == 0, "flattened spatial extent must be lane-dense"

    PACK = 128
    assert Cin + 11 <= PACK and hidden + 1 <= PACK

    # Pure reshape (no transpose / extra XLA copy): batch goes on the grid.
    x_flat = x_nchw.reshape(B, Cin, HW)

    # Fold BN scales into conv weights; pack everything hidden-rowed into one
    # lane-dense buffer, projection params into a second one.
    w1f = (params["w1"] * params["s1"]).T                        # (hidden, Cin)
    wdwf = (params["wdw"].reshape(9, hidden) * params["s2"]).T   # (hidden, 9)
    b1 = params["b1"].T                                          # (hidden, 1)
    b2 = params["b2"].T                                          # (hidden, 1)
    pack1 = jnp.concatenate([w1f, wdwf, b1, b2], axis=1)         # (hidden, Cin+11)
    pack1 = jnp.pad(pack1, ((0, 0), (0, PACK - pack1.shape[1]))).astype(jnp.float32)

    w3f = (params["w3"] * params["s3"]).T                        # (Cout, hidden)
    b3 = params["b3"].T                                          # (Cout, 1)
    pack3 = jnp.concatenate([w3f, b3], axis=1)                   # (Cout, hidden+1)
    pack3 = jnp.pad(pack3, ((0, 0), (0, PACK - pack3.shape[1]))).astype(jnp.float32)

    kernel = functools.partial(_mbconv_kernel, Cin=Cin, hidden=hidden,
                               H=H, W=W, use_residual=use_residual)

    out = pl.pallas_call(
        kernel,
        out_shape=jax.ShapeDtypeStruct((B, Cout, HW), x_nchw.dtype),
        grid=(B,),
        in_specs=[
            pl.BlockSpec((None, Cin, HW), lambda b: (b, 0, 0)),   # x (one image)
            pl.BlockSpec((hidden, PACK), lambda b: (0, 0)),       # packed expand/dw params
            pl.BlockSpec((Cout, PACK), lambda b: (0, 0)),         # packed project params
        ],
        out_specs=pl.BlockSpec((None, Cout, HW), lambda b: (b, 0, 0)),
        compiler_params=pltpu.CompilerParams(
            dimension_semantics=("parallel",)),                   # both TCs on v7x
    )(x_flat, pack1, pack3)

    return out.reshape(B, Cout, H, W)


def _fold_bn(gamma, beta, mean, var, eps=1e-5):
    scale = gamma / jnp.sqrt(var + eps)
    bias = beta - mean * scale
    return scale[None, :], bias[None, :]


def make_params(key, in_channels, out_channels, expand_ratio=4):
    hidden = in_channels * expand_ratio
    ks = jax.random.split(key, 15)

    def bn(kg, kb, km, kv, c):
        gamma = 1.0 + 0.1 * jax.random.normal(kg, (c,), jnp.float32)
        beta = 0.1 * jax.random.normal(kb, (c,), jnp.float32)
        mean = 0.1 * jax.random.normal(km, (c,), jnp.float32)
        var = 1.0 + 0.05 * jnp.abs(jax.random.normal(kv, (c,), jnp.float32))
        return _fold_bn(gamma, beta, mean, var)

    w1 = 0.2 * jax.random.normal(ks[0], (in_channels, hidden), jnp.float32)
    wdw = 0.2 * jax.random.normal(ks[1], (3, 3, hidden), jnp.float32)
    w3 = 0.2 * jax.random.normal(ks[2], (hidden, out_channels), jnp.float32)
    s1, b1 = bn(ks[3], ks[4], ks[5], ks[6], hidden)
    s2, b2 = bn(ks[7], ks[8], ks[9], ks[10], hidden)
    s3, b3 = bn(ks[11], ks[12], ks[13], ks[14], out_channels)
    return dict(w1=w1, s1=s1, b1=b1, wdw=wdw, s2=s2, b2=b2,
                w3=w3, s3=s3, b3=b3)


def mbconv_reference(x_nhwc, params, *, use_residual=True):
    x = x_nhwc.astype(jnp.float32)
    h = jnp.einsum("bhwc,cd->bhwd", x, params["w1"])
    h = jnp.clip(h * params["s1"][0] + params["b1"][0], 0.0, 6.0)
    w = params["wdw"][:, :, None, :]            # HWIO, I=1 (depthwise)
    h2 = jax.lax.conv_general_dilated(
        h, w, window_strides=(1, 1), padding=((1, 1), (1, 1)),
        dimension_numbers=("NHWC", "HWIO", "NHWC"),
        feature_group_count=h.shape[-1])
    h2 = jnp.clip(h2 * params["s2"][0] + params["b2"][0], 0.0, 6.0)
    y = jnp.einsum("bhwc,cd->bhwd", h2, params["w3"])
    y = y * params["s3"][0] + params["b3"][0]
    if use_residual:
        y = y + x
    return y


if __name__ == "__main__":
    key = jax.random.PRNGKey(0)
    kx, kp = jax.random.split(key)

    B, Cin, H, W = 2, 4, 16, 16          # matches x: [2, 4, 16, 16] in NCHW
    Cout, expand = 4, 4                  # stride=1, Cin==Cout -> residual path

    x_nchw = jax.random.normal(kx, (B, Cin, H, W), jnp.float32)
    params = make_params(kp, Cin, Cout, expand)

    out = mbconv_forward(x_nchw, params, stride=1)
    out = jax.block_until_ready(out)
    assert out.shape == (B, Cout, H, W)

    x_nhwc = jnp.transpose(x_nchw, (0, 2, 3, 1))
    ref = mbconv_reference(x_nhwc, params, use_residual=True)
    out_nhwc = jnp.transpose(out, (0, 2, 3, 1))
    assert jnp.allclose(out_nhwc, ref, atol=1e-4, rtol=1e-4), (
        float(jnp.max(jnp.abs(out_nhwc - ref))))

    print("KERNEL_OK")
</pallas_src>

<mosaic_0001>
module attributes {stable_mosaic.version = 11 : i64} {
  func.func @_mbconv_kernel(%arg0: i32, %arg1: memref<1x4x256xf32, #tpu.memory_space<vmem>>, %arg2: memref<16x128xf32, #tpu.memory_space<vmem>>, %arg3: memref<4x128xf32, #tpu.memory_space<vmem>>, %arg4: memref<1x4x256xf32, #tpu.memory_space<vmem>>) attributes {dimension_semantics = [#tpu.dimension_semantics<parallel>], iteration_bounds = array<i64: 2>, scalar_prefetch = 0 : i64, scratch_operands = 0 : i64, tpu.core_type = #tpu.core_type<tc>, window_params = [{transform_indices = @transform_0, window_bounds = array<i64: 1, 4, 256>}, {pipeline_mode = #tpu.pipeline_mode<synchronous>, transform_indices = @transform_1, window_bounds = array<i64: 16, 128>}, {pipeline_mode = #tpu.pipeline_mode<synchronous>, transform_indices = @transform_2, window_bounds = array<i64: 4, 128>}, {transform_indices = @transform_3, window_bounds = array<i64: 1, 4, 256>}]} {
    %c0 = arith.constant 0 : index
    %c0_0 = arith.constant 0 : index
    %c0_1 = arith.constant 0 : index
    %0 = vector.load %arg1[%c0, %c0_0, %c0_1] : memref<1x4x256xf32, #tpu.memory_space<vmem>>, vector<1x4x256xf32>
    %1 = vector.shape_cast %0 : vector<1x4x256xf32> to vector<4x256xf32>
    %c0_2 = arith.constant 0 : index
    %c0_3 = arith.constant 0 : index
    %2 = vector.load %arg2[%c0_2, %c0_3] : memref<16x128xf32, #tpu.memory_space<vmem>>, vector<16x128xf32>
    %3 = vector.extract_strided_slice %2 {offsets = [0, 0], sizes = [16, 4], strides = [1, 1]} : vector<16x128xf32> to vector<16x4xf32>
    %4 = vector.extract_strided_slice %2 {offsets = [0, 4], sizes = [16, 9], strides = [1, 1]} : vector<16x128xf32> to vector<16x9xf32>
    %5 = vector.extract_strided_slice %2 {offsets = [0, 13], sizes = [16, 1], strides = [1, 1]} : vector<16x128xf32> to vector<16x1xf32>
    %6 = vector.extract_strided_slice %2 {offsets = [0, 14], sizes = [16, 1], strides = [1, 1]} : vector<16x128xf32> to vector<16x1xf32>
    %cst = arith.constant dense<0.000000e+00> : vector<16x256xf32>
    %7 = tpu.matmul %3, %1, %cst {dimension_numbers = #tpu.dot_dimension_numbers<[1], [0], [0], [1], [0, 0, 1, 1], [], []>} : vector<16x4xf32>, vector<4x256xf32>, vector<16x256xf32> -> vector<16x256xf32>
    %8 = vector.broadcast %5 : vector<16x1xf32> to vector<16x256xf32>
    %9 = arith.addf %7, %8 : vector<16x256xf32>
    %cst_4 = arith.constant 0.000000e+00 : f32
    %cst_5 = arith.constant 6.000000e+00 : f32
    %10 = vector.broadcast %cst_4 : f32 to vector<16x256xf32>
    %11 = arith.maximumf %10, %9 : vector<16x256xf32>
    %12 = vector.broadcast %cst_5 : f32 to vector<16x256xf32>
    %13 = arith.minimumf %12, %11 : vector<16x256xf32>
    %14 = tpu.iota {dimensions = array<i32: 1>} : vector<1x256xi32>
    %c15_i32 = arith.constant 15 : i32
    %15 = vector.broadcast %c15_i32 : i32 to vector<1x256xi32>
    %16 = arith.andi %14, %15 : vector<1x256xi32>
    %c4_i32 = arith.constant 4 : i32
    %17 = vector.broadcast %c4_i32 : i32 to vector<1x256xi32>
    %18 = arith.shrsi %14, %17 : vector<1x256xi32>
    %c0_i32 = arith.constant 0 : i32
    %19 = vector.broadcast %c0_i32 : i32 to vector<1x256xi32>
    %20 = arith.cmpi sgt, %16, %19 : vector<1x256xi32>
    %c1_i32 = arith.constant 1 : i32
    %21 = tpu.dynamic_rotate %13 by %c1_i32 dim 1 : vector<16x256xf32>, i32 -> vector<16x256xf32>
    %cst_6 = arith.constant 0.000000e+00 : f32
    %22 = vector.shape_cast %20 : vector<1x256xi1> to vector<1x256xi1>
    %23 = vector.broadcast %22 : vector<1x256xi1> to vector<16x256xi1>
    %24 = vector.broadcast %cst_6 : f32 to vector<16x256xf32>
    %25 = arith.select %23, %21, %24 : vector<16x256xi1>, vector<16x256xf32>
    %c15_i32_7 = arith.constant 15 : i32
    %26 = vector.broadcast %c15_i32_7 : i32 to vector<1x256xi32>
    %27 = arith.cmpi slt, %16, %26 : vector<1x256xi32>
    %c255_i32 = arith.constant 255 : i32
    %28 = tpu.dynamic_rotate %13 by %c255_i32 dim 1 : vector<16x256xf32>, i32 -> vector<16x256xf32>
    %cst_8 = arith.constant 0.000000e+00 : f32
    %29 = vector.shape_cast %27 : vector<1x256xi1> to vector<1x256xi1>
    %30 = vector.broadcast %29 : vector<1x256xi1> to vector<16x256xi1>
    %31 = vector.broadcast %cst_8 : f32 to vector<16x256xf32>
    %32 = arith.select %30, %28, %31 : vector<16x256xi1>, vector<16x256xf32>
    %33 = vector.extract_strided_slice %4 {offsets = [0, 0], sizes = [16, 1], strides = [1, 1]} : vector<16x9xf32> to vector<16x1xf32>
    %34 = vector.broadcast %33 : vector<16x1xf32> to vector<16x256xf32>
    %35 = arith.mulf %25, %34 : vector<16x256xf32>
    %36 = vector.extract_strided_slice %4 {offsets = [0, 1], sizes = [16, 1], strides = [1, 1]} : vector<16x9xf32> to vector<16x1xf32>
    %37 = vector.broadcast %36 : vector<16x1xf32> to vector<16x256xf32>
    %38 = arith.mulf %13, %37 : vector<16x256xf32>
    %39 = arith.addf %35, %38 : vector<16x256xf32>
    %40 = vector.extract_strided_slice %4 {offsets = [0, 2], sizes = [16, 1], strides = [1, 1]} : vector<16x9xf32> to vector<16x1xf32>
    %41 = vector.broadcast %40 : vector<16x1xf32> to vector<16x256xf32>
    %42 = arith.mulf %32, %41 : vector<16x256xf32>
    %43 = arith.addf %39, %42 : vector<16x256xf32>
    %44 = vector.extract_strided_slice %4 {offsets = [0, 3], sizes = [16, 1], strides = [1, 1]} : vector<16x9xf32> to vector<16x1xf32>
    %45 = vector.broadcast %44 : vector<16x1xf32> to vector<16x256xf32>
    %46 = arith.mulf %25, %45 : vector<16x256xf32>
    %47 = vector.extract_strided_slice %4 {offsets = [0, 4], sizes = [16, 1], strides = [1, 1]} : vector<16x9xf32> to vector<16x1xf32>
    %48 = vector.broadcast %47 : vector<16x1xf32> to vector<16x256xf32>
    %49 = arith.mulf %13, %48 : vector<16x256xf32>
    %50 = arith.addf %46, %49 : vector<16x256xf32>
    %51 = vector.extract_strided_slice %4 {offsets = [0, 5], sizes = [16, 1], strides = [1, 1]} : vector<16x9xf32> to vector<16x1xf32>
    %52 = vector.broadcast %51 : vector<16x1xf32> to vector<16x256xf32>
    %53 = arith.mulf %32, %52 : vector<16x256xf32>
    %54 = arith.addf %50, %53 : vector<16x256xf32>
    %55 = vector.extract_strided_slice %4 {offsets = [0, 6], sizes = [16, 1], strides = [1, 1]} : vector<16x9xf32> to vector<16x1xf32>
    %56 = vector.broadcast %55 : vector<16x1xf32> to vector<16x256xf32>
    %57 = arith.mulf %25, %56 : vector<16x256xf32>
    %58 = vector.extract_strided_slice %4 {offsets = [0, 7], sizes = [16, 1], strides = [1, 1]} : vector<16x9xf32> to vector<16x1xf32>
    %59 = vector.broadcast %58 : vector<16x1xf32> to vector<16x256xf32>
    %60 = arith.mulf %13, %59 : vector<16x256xf32>
    %61 = arith.addf %57, %60 : vector<16x256xf32>
    %62 = vector.extract_strided_slice %4 {offsets = [0, 8], sizes = [16, 1], strides = [1, 1]} : vector<16x9xf32> to vector<16x1xf32>
    %63 = vector.broadcast %62 : vector<16x1xf32> to vector<16x256xf32>
    %64 = arith.mulf %32, %63 : vector<16x256xf32>
    %65 = arith.addf %61, %64 : vector<16x256xf32>
    %66 = vector.broadcast %6 : vector<16x1xf32> to vector<16x256xf32>
    %67 = arith.addf %54, %66 : vector<16x256xf32>
    %c0_i32_9 = arith.constant 0 : i32
    %68 = vector.broadcast %c0_i32_9 : i32 to vector<1x256xi32>
    %69 = arith.cmpi sgt, %18, %68 : vector<1x256xi32>
    %c16_i32 = arith.constant 16 : i32
    %70 = tpu.dynamic_rotate %43 by %c16_i32 dim 1 : vector<16x256xf32>, i32 -> vector<16x256xf32>
    %cst_10 = arith.constant 0.000000e+00 : f32
    %71 = vector.shape_cast %69 : vector<1x256xi1> to vector<1x256xi1>
    %72 = vector.broadcast %71 : vector<1x256xi1> to vector<16x256xi1>
    %73 = vector.broadcast %cst_10 : f32 to vector<16x256xf32>
    %74 = arith.select %72, %70, %73 : vector<16x256xi1>, vector<16x256xf32>
    %75 = arith.addf %67, %74 : vector<16x256xf32>
    %c15_i32_11 = arith.constant 15 : i32
    %76 = vector.broadcast %c15_i32_11 : i32 to vector<1x256xi32>
    %77 = arith.cmpi slt, %18, %76 : vector<1x256xi32>
    %c240_i32 = arith.constant 240 : i32
    %78 = tpu.dynamic_rotate %65 by %c240_i32 dim 1 : vector<16x256xf32>, i32 -> vector<16x256xf32>
    %cst_12 = arith.constant 0.000000e+00 : f32
    %79 = vector.shape_cast %77 : vector<1x256xi1> to vector<1x256xi1>
    %80 = vector.broadcast %79 : vector<1x256xi1> to vector<16x256xi1>
    %81 = vector.broadcast %cst_12 : f32 to vector<16x256xf32>
    %82 = arith.select %80, %78, %81 : vector<16x256xi1>, vector<16x256xf32>
    %83 = arith.addf %75, %82 : vector<16x256xf32>
    %cst_13 = arith.constant 0.000000e+00 : f32
    %cst_14 = arith.constant 6.000000e+00 : f32
    %84 = vector.broadcast %cst_13 : f32 to vector<16x256xf32>
    %85 = arith.maximumf %84, %83 : vector<16x256xf32>
    %86 = vector.broadcast %cst_14 : f32 to vector<16x256xf32>
    %87 = arith.minimumf %86, %85 : vector<16x256xf32>
    %c0_15 = arith.constant 0 : index
    %c0_16 = arith.constant 0 : index
    %88 = vector.load %arg3[%c0_15, %c0_16] : memref<4x128xf32, #tpu.memory_space<vmem>>, vector<4x128xf32>
    %89 = vector.extract_strided_slice %88 {offsets = [0, 0], sizes = [4, 16], strides = [1, 1]} : vector<4x128xf32> to vector<4x16xf32>
    %90 = vector.extract_strided_slice %88 {offsets = [0, 16], sizes = [4, 1], strides = [1, 1]} : vector<4x128xf32> to vector<4x1xf32>
    %cst_17 = arith.constant dense<0.000000e+00> : vector<4x256xf32>
    %91 = tpu.matmul %89, %87, %cst_17 {dimension_numbers = #tpu.dot_dimension_numbers<[1], [0], [0], [1], [0, 0, 1, 1], [], []>} : vector<4x16xf32>, vector<16x256xf32>, vector<4x256xf32> -> vector<4x256xf32>
    %92 = vector.broadcast %90 : vector<4x1xf32> to vector<4x256xf32>
    %93 = arith.addf %91, %92 : vector<4x256xf32>
    %94 = arith.addf %93, %1 : vector<4x256xf32>
    %c0_18 = arith.constant 0 : index
    %c0_19 = arith.constant 0 : index
    %c0_20 = arith.constant 0 : index
    %95 = vector.load %arg4[%c0_18, %c0_19, %c0_20] : memref<1x4x256xf32, #tpu.memory_space<vmem>>, vector<1x4x256xf32>
    %96 = vector.shape_cast %95 : vector<1x4x256xf32> to vector<4x256xf32>
    %97 = vector.shape_cast %94 : vector<4x256xf32> to vector<1x4x256xf32>
    tpu.vector_store %arg4[%c0_18, %c0_19, %c0_20], %97 {strides = array<i32>} : memref<1x4x256xf32, #tpu.memory_space<vmem>>, vector<1x4x256xf32>,
    return
  }
  func.func @transform_0(%arg0: i32) -> (i32, i32, i32) {
    %c0_i32 = arith.constant 0 : i32
    %c0_i32_0 = arith.constant 0 : i32
    %c0_i32_1 = arith.constant 0 : i32
    return %arg0, %c0_i32, %c0_i32_0 : i32, i32, i32
  }
  func.func @transform_1(%arg0: i32) -> (i32, i32) {
    %c0_i32 = arith.constant 0 : i32
    %c0_i32_0 = arith.constant 0 : i32
    %c0_i32_1 = arith.constant 0 : i32
    return %c0_i32, %c0_i32_0 : i32, i32
  }
  func.func @transform_2(%arg0: i32) -> (i32, i32) {
    %c0_i32 = arith.constant 0 : i32
    %c0_i32_0 = arith.constant 0 : i32
    %c0_i32_1 = arith.constant 0 : i32
    return %c0_i32, %c0_i32_0 : i32, i32
  }
  func.func @transform_3(%arg0: i32) -> (i32, i32, i32) {
    %c0_i32 = arith.constant 0 : i32
    %c0_i32_0 = arith.constant 0 : i32
    %c0_i32_1 = arith.constant 0 : i32
    return %arg0, %c0_i32, %c0_i32_0 : i32, i32, i32
  }
}

</mosaic_0001>

<bundles_post_ra>
// kernel: tpu_custom_call.1
= control target key start
LH: loop header
LB: loop body
LE: loop exit
PB: predicated region body
PF: predicated region fallthrough
CT: control target
= control target key end

     0   :  { %8 = vsyncpa [#allocation3], 0  ;;  %s1480_s0 = inlined_call_operand.hbm [shape: f32[2,4,256], index: 0, kind: input, shape index: {}]   ;;  %s1481_s1 = inlined_call_operand.hbm [shape: f32[16,128], index: 1, kind: input, shape index: {}]   ;;  %s1482_s2 = inlined_call_operand.vmem [shape: f32[4,128], index: 2, kind: input, shape index: {}]   ;;  %s1483_s3 = inlined_call_operand.hbm [shape: f32[2,4,256], index: 3, kind: output, shape index: {}]  }
   0x1   :  { %10 = vsyncpa [#allocation3 + $0x1], 0 }
   0x2   :  { %11 = vsyncpa [#allocation6], 0 }
   0x3   :  { %12 = vsyncpa [#allocation4], 0 }
   0x4   :  { %14 = vsyncpa [#allocation4 + $0x1], 0  ;;  %s1050_s12 = smov 0   ;;  %s1052_s13 = smov 0  }
   0x5   :  { %s1054_s14 = smov 0   ;;  %s1056_s15 = smov 0  }
   0x6 LB: > { %s1071_s16 = sadd.s32 4294967295, %s1006_s15   ;;  %s754_s17 = sadd.s32 4294967294, %s1006_s15   ;;  %s1006_s15 = sphi %s1056_s15, %s1519_s15   ;;  %s1002_s14 = sphi %s1054_s14, %s1518_s14   ;;  %s998_s13 = sphi %s1052_s13, %s1517_s13   ;;  %s994_s12 = sphi %s1050_s12, %s1516_s12  }
   0x7   : > { %p40_p0 = scmp.ne.s32.totalorder %s998_s13, %s994_s12  ;;  %p1484_p1 = scmp.eq.s32.totalorder %s1071_s16, 0 }
   0x8   : > { %p112_p3 = scmp.eq.s32.totalorder %s754_s17, 1  ;;  %p755_p5 = scmp.ge.s32.totalorder %s1006_s15, 1 }
   0x9   : > { %p1080_p4 = por %p1484_p1, %p40_p0  ;;  %p119_p7 = scmp.lt.s32.totalorder %s1006_s15, 3 }
   0xa   : > { %p1085_p6 = por %p112_p3, %p40_p0  ;;  %s1008_s21 = smov [#allocation5]  }
   0xb   : > { %s1487_s18 = scalar_select %p1080_p4, 1, 0 }
   0xc   : > { %s1488_s19 = scalar_select %p1085_p6, 1, 0 }
   0xd   : > { %p1090_p8 = pnand %p755_p5, %p119_p7  ;;  %s131_s22 = sshll.u32 %s1008_s21, 4  ;;  %s1094_s22 = int_to_ptr.vmem [resolvable:$true] %s131_s22 }
   0xe   : > { %s1106_s24 = sadd.s32 1, %s1006_s15   ;;  %s27_s25 = sadd.s32 1, %s1002_s14 }
   0xf   : > { %s1489_s20 = scalar_select %p1090_p8, 1, 0 }
  0x10   : > { %p789_p9 = pneg %p1090_p8  ;;  %s24_s26 = ssub.s32 %s1006_s15, %s1106_s24 }
  0x11   : > { %s878_s29 = scalar_lea.hbm %s1481_s1, 256 }
  0x12   : > { %p1101_p11 = pnand %p789_p9, %p1484_p1  ;;  %p879_p12 = scmp.ne.s32.totalorder %s1481_s1, %s878_s29 }
  0x13   : > { %p885_p5 = scmp.lt.u32.totalorder %s878_s29, %s1481_s1 }
  0x14   : > { %p880_p13 = pneg %p1101_p11 }
  0x16   : > { %p881_p0 = pnand %p880_p13, %p879_p12 }
  0x18   : > { %p882_p3 = pneg %p881_p0 }
  0x1a   : > { %p887_p7 = pnand %p885_p5, %p882_p3 }
  0x1c   : > { %890 = shalt.err (!%p887_p7)
}
  0x1d   : > { %s891_s7 = scalar_lea.vmem %s1094_s22, 256  ;;  %p899_p2 = scmp.lt.s32.totalorder %s1094_s22, %s1094_s22 }
  0x1e   : > { %p892_p9 = scmp.ne.s32.totalorder %s1094_s22, %s891_s7  ;;  %p900_p6 = scmp.lt.s32.totalorder %s891_s7, %s891_s7 }
  0x20   : > { %p894_p10 = pnand %p892_p9, %p880_p13  ;;  %p901_p4 = por %p900_p6, %p899_p2 }
  0x22   : > { %p895_p1 = pneg %p894_p10 }
  0x24   : > { %p902_p8 = pnand %p901_p4, %p895_p1 }
  0x26   : > { %905 = shalt.err (!%p902_p8)
}
  0x27   : > { %s1009_s8 = smov 128   ;;  %s1010_s9 = smov 8  }
  0x28   : > { %792 = dma.hbm_to_vmem [thread:$0]  (!%p1101_p11), %s1481_s1, 256, %s1094_s22, [#allocation6], %s1009_s8, %s1009_s8, %s1010_s9  }
  0x29   : > { %p25_p2 = scmp.eq.s32.totalorder %s24_s26, 0  ;;  %p34_p1 = scmp.ne.s32.totalorder %s1002_s14, %s998_s13 }
  0x2a   : > { %p35_p4 = scmp.eq.s32.totalorder %s1006_s15, 0  ;;  %p802_p6 = scmp.lt.s32.totalorder %s1006_s15, 2 }
  0x2b   : > { %s1137_s17 = scalar_select %p25_p2, %s1002_s14, %s27_s25  }
  0x2c   : > { %p36_p8 = por %p35_p4, %p34_p1  ;;  %p1491_p10 = scmp.eq.s32.totalorder %s1071_s16, 1 }
  0x2d   : > { %s148_s27 = sand.u32 1, %s1002_s14   ;;  %s775_s28 = sshll.u32 %s1006_s15, 7 }
  0x2e   : > { %p1141_p12 = por %p1491_p10, %p34_p1  ;;  %s758_s29 = sshll.u32 %s148_s27, 3 }
  0x2f   : > { %s1150_s4 = scalar_lea.hbm %s1480_s0, %s775_s28  ;;  %s152_s22 = scalar_lea.vmem [#allocation2], %s758_s29 }
  0x30   : > { %s160_s25 = sshll.u32 %s152_s22, 4  ;;  %p1152_p11 = pnand %p802_p6, %p36_p8  ;;  %s1156_s25 = int_to_ptr.vmem [resolvable:$true] %s160_s25 }
  0x31   : > { %s149_s5 = scalar_lea.sflag [#allocation3], %s148_s27  ;;  %s906_s6 = scalar_lea.hbm %s1150_s4, 128 }
  0x32   : > { %p907_p13 = scmp.ne.s32.totalorder %s1150_s4, %s906_s6  ;;  %p908_p0 = pneg %p1152_p11 }
  0x33   : > { %s911_s9 = scalar_lea.hbm %s1480_s0, 256  ;;  %p912_p7 = scmp.lt.u32.totalorder %s1150_s4, %s1480_s0 }
  0x34   : > { %p909_p3 = pnand %p908_p0, %p907_p13  ;;  %p913_p9 = scmp.lt.u32.totalorder %s911_s9, %s906_s6 }
  0x35   : > { %p915_p1 = scmp.lt.u32.totalorder %s906_s6, %s1150_s4 }
  0x36   : > { %p910_p5 = pneg %p909_p3  ;;  %p914_p2 = por %p913_p9, %p912_p7 }
  0x38   : > { %p916_p4 = por %p915_p1, %p914_p2 }
  0x3a   : > { %p917_p6 = pnand %p916_p4, %p910_p5 }
  0x3c   : > { %920 = shalt.err (!%p917_p6)
}
  0x3d   : > { %s921_s27 = scalar_lea.vmem %s1156_s25, 128  ;;  %s1011_s28 = smov [#allocation2]  }
  0x3e   : > { %p922_p8 = scmp.ne.s32.totalorder %s1156_s25, %s921_s27  ;;  %s926_s29 = sshll.u32 %s1011_s28, 4  ;;  %s927_s29 = int_to_ptr.vmem [resolvable:$false] %s926_s29 }
  0x3f   : > { %s928_s23 = scalar_lea.vmem %s927_s29, 256  ;;  %p929_p3 = scmp.lt.s32.totalorder %s1156_s25, %s927_s29 }
  0x40   : > { %p924_p10 = pnand %p922_p8, %p908_p0  ;;  %p930_p7 = scmp.lt.s32.totalorder %s928_s23, %s921_s27 }
  0x42   : > { %p925_p13 = pneg %p924_p10  ;;  %p931_p9 = por %p930_p7, %p929_p3 }
  0x44   : > { %p932_p2 = pnand %p931_p9, %p925_p13 }
  0x46   : > { %935 = shalt.err (!%p932_p2)
}
  0x47   : > { %796 = dma.hbm_to_vmem [thread:$0]  (!%p1152_p11), %s1150_s4, 128, %s1156_s25, %s149_s5  }
  0x48   : > { %p1494_p5 = scmp.ne.s32.totalorder %s1489_s20, 0 }
  0x49   : > { %s1186_s30 = sand.u32 (!%p1494_p5), 1, %s998_s13   ;;  %p1495_p0 = scmp.ne.s32.totalorder (!%p1494_p5), %s1487_s18, 0 }
  0x4a   : > { %169 = sbr.rel (%p1494_p5) target bundleno = 820 (0x334), region = 32  ;;  %s762_s22 = sshll.u32 (!%p1494_p5), %s1186_s30, 3 }
  0x4b   : > { %s172_s6 = scalar_lea.sflag (!%p1494_p5), [#allocation3], %s1186_s30  ;;  %s175_s7 = scalar_lea.vmem (!%p1494_p5), [#allocation2], %s762_s22 }
  0x51   : > { %981 = dma.done.wait (%p1495_p0), %s172_s6, 128  }
  0x52   : > { %983 = vsyncadd (%p1495_p0), %s172_s6, 4294967168  ;;  %p1496_p11 = scmp.eq.s32.totalorder %s1071_s16, 0 }
  0x54   : > { %985 = dma.done.wait (%p1496_p11), [#allocation6], 256   ;;  %p1497_p1 = pmov %p1496_p11 }
  0x55   : > { %v1012_v0 = vmov 0.0   ;;  %v1013_v1 = vmov 4   ;;  %v1014_v2 = vmov 13   ;;  %v1200_v3 = vld [vmem:[%s175_s7] sm:$0xff]  ;;  %vm222_vm0 = vcmask 1043456   ;;  %v1202_v4 = vld [vmem:[#allocation5] sm:$0xff] }
  0x56   : > { %987 = vsyncadd (%p1497_p1), [#allocation6], 4294967040  ;;  %291 = vmatprep.mubr.f32.mxu0 %v1012_v0  ;;  %858 = vset.pattern.permute.xlu1 %v1013_v1  ;;  %v1206_v5 = vcombine.high %v1200_v3, %v1200_v3  ;;  %vm217_vm1 = vcmask 31744   ;;  %v1212_v6 = vld [vmem:[#allocation5 + $0x8] sm:$0xff]  ;;  %v1015_v7 = vmov 5   ;;  %v1016_v8 = vmov 6  }
  0x57   : > { %857 = vset.pattern.permute.xlu0 %v1014_v2  ;;  %644 = vmatprep.mubr.f32.mxu1 %v1012_v0  ;;  %v1017_v9 = vmov 10   ;;  %v1018_v10 = vmov 11   ;;  %v1019_v11 = vmov 12   ;;  %v1020_v12 = vmov 7   ;;  %s1021_s18 = smov 127   ;;  %s1022_s20 = smov 1  }
  0x58   : > { %366 = vperm.xlu1 %858, %v1202_v4   ;;  %207 = vperm.xlu0 %857, %v1202_v4   ;;  %v1023_v31 = vmov 8   ;;  %v1024_v32 = vmov 14   ;;  %v1025_v33 = vmov 9   ;;  %v312_v42 = vlaneseq  ;;  %s1026_s4 = smov 16   ;;  %s1027_s25 = smov 112  }
  0x59   : > { %765 = vmatprep.subr.msk.mxu0 %vm222_vm0, %v1206_v5  ;;  %vm577_vm14 = vcmask 130048   ;;  %s776_s8 = sshll.u32 %s1071_s16, 7  ;;  %s201_s9 = scalar_lea.vmem [#allocation7], %s762_s22 }
  0x5a   : > { %766 = vmatpush1.msk.msra.mxu0 %vm222_vm0, %v1200_v3  ;;  %v1262_v45 = vand.u32 127, %v312_v42  ;;  %s674_s10 = sshll.u32 %s201_s9, 4  ;;  %s1436_s28 = scalar_lea.hbm %s1483_s3, %s776_s8  ;;  %s1438_s10 = int_to_ptr.vmem [resolvable:$true] %s674_s10 }
  0x5b   : > { %767 = vmatmul.mubr.msk.f32.vlgmr.msra.gmra.mrb[0].mxu0 %vm217_vm1, %v1202_v4  ;;  %s660_s29 = scalar_lea.sflag [#allocation4], %s1186_s30  ;;  %s936_s23 = scalar_lea.vmem %s1438_s10, 128 }
  0x5c   : > { %370 = vperm.xlu1 %858, %v1212_v6   ;;  %297 = vmatprep.mubr.f32.mxu0 %v1012_v0  ;;  %v1267_v48 = vadd.s32 128, %v1262_v45  ;;  %v315_v49 = vand.u32 15, %v1262_v45  ;;  %vm329_vm2 = vcmp.lt.s32.totalorder %v1262_v45, 1  ;;  %vm352_vm5 = vcmp.lt.s32.totalorder %v1262_v45, 127  ;;  %p937_p4 = scmp.ne.s32.totalorder %s1438_s10, %s936_s23  ;;  %s1029_s16 = smov [#allocation7]  }
  0x5d   : > { %212 = vperm.xlu0 %857, %v1212_v6   ;;  %vm519_vm8 = vcmp.lt.s32.totalorder %v1262_v45, 16  ;;  %vm546_vm9 = vcmp.lt.s32.totalorder %v1262_v45, 112  ;;  %s940_s22 = sshll.u32 %s1029_s16, 4  ;;  %s941_s22 = int_to_ptr.vmem [resolvable:$false] %s940_s22 }
  0x5e   : > { %v316_v52 = vand.u32 15, %v1267_v48  ;;  %vm1272_vm3 = vcmp.gt.s32.totalorder %v315_v49, 0  ;;  %vm1290_vm6 = vcmp.lt.s32.totalorder %v315_v49, 15  ;;  %p938_p6 = pnand %p937_p4, %p1141_p12  ;;  %s942_s6 = scalar_lea.vmem %s941_s22, 256 }
  0x5f   : > { %768 = vmatmul.mubr.msk.f32.gmra.mrb[2].mxu0 %vm217_vm1, %v1212_v6  ;;  %p943_p10 = scmp.lt.s32.totalorder %s1438_s10, %s941_s22  ;;  %p944_p13 = scmp.lt.s32.totalorder %s942_s6, %s936_s23 }
  0x60   : > { %860 = vset.pattern.permute.xlu1 %v1015_v7  ;;  %vm1276_vm4 = vcmp.gt.s32.totalorder %v316_v52, 0  ;;  %vm1294_vm7 = vcmp.lt.s32.totalorder %v316_v52, 15  ;;  %p939_p8 = pneg %p938_p6 }
  0x61   : > { %382 = vperm.xlu1 %860, %v1212_v6   ;;  %859 = vset.pattern.permute.xlu0 %v1015_v7  ;;  %p945_p3 = por %p944_p13, %p943_p10 }
  0x62   : > { %378 = vperm.xlu0 %859, %v1202_v4  }
  0x63   : > { %p946_p7 = pnand %p945_p3, %p939_p8 }
  0x65   : > { %861 = vset.pattern.permute.xlu1 %v1016_v8 }
  0x66   : > { %394 = vperm.xlu1 %861, %v1202_v4   ;;  %862 = vset.pattern.permute.xlu0 %v1016_v8 }
  0x67   : > { %398 = vperm.xlu0 %862, %v1212_v6  }
  0x6a   : > { %863 = vset.pattern.permute.xlu1 %v1017_v9 }
  0x6b   : > { %454 = vperm.xlu1 %863, %v1202_v4   ;;  %864 = vset.pattern.permute.xlu0 %v1018_v10 }
  0x6c   : > { %466 = vperm.xlu0 %864, %v1202_v4  }
  0x6f   : > { %458 = vperm.xlu1 %863, %v1212_v6  }
  0x70   : > { %867 = vset.pattern.permute.xlu0 %v1019_v11 }
  0x71   : > { %486 = vperm.xlu0 %867, %v1212_v6  }
  0x73   : > { %865 = vset.pattern.permute.xlu1 %v1018_v10 }
  0x74   : > { %470 = vperm.xlu1 %865, %v1212_v6  }
  0x75   : > { %868 = vset.pattern.permute.xlu0 %v1020_v12 }
  0x78   : > { %866 = vset.pattern.permute.xlu1 %v1019_v11 }
  0x79   : > { %482 = vperm.xlu1 %866, %v1202_v4  }
  0x7d   : > { %869 = vset.pattern.permute.xlu1 %v1020_v12 }
  0xd7   : > { %v208_v13 = vpop.permute.xlu0 %207  ;;  %v367_v34 = vpop.permute.xlu1 %366 }
  0xdb   : > { %v1252_v35 = vpop.permute.xlu1 %370 }
  0xdc   : > { %v213_v19 = vpop.permute.xlu0 %212 }
  0xe0   : > { %v1254_v36 = vpop.permute.xlu1 %382 }
  0xe1   : > { %v379_v38 = vpop.permute.xlu0 %378 }
  0xe5   : > { %v395_v37 = vpop.permute.xlu1 %394 }
  0xe6   : > { %v1256_v40 = vpop.permute.xlu0 %398 }
  0xea   : > { %v455_v39 = vpop.permute.xlu1 %454 }
  0xeb   : > { %v467_v43 = vpop.permute.xlu0 %466 }
  0xee   : > { %v1258_v41 = vpop.permute.xlu1 %458 }
  0xf0   : > { %v1264_v47 = vpop.permute.xlu0 %486 }
  0xf3   : > { %v1260_v44 = vpop.permute.xlu1 %470 }
  0xf8   : > { %v483_v46 = vpop.permute.xlu1 %482 }
 0x12e   : > { %v293_v14 = vpop.f32.mrb[0].mxu0 }
 0x12f   : > { %v294_v15 = vadd.f32 %v293_v14, %v208_v13  ;;  %v295_v16 = vpop.f32.mrb[1].mxu0 }
 0x130   : > { %v296_v17 = vadd.f32 %v295_v16, %v208_v13 }
 0x131   : > { %v304_v18 = vmax.f32 %v294_v15, 0.0 }
 0x132   : > { %v299_v20 = vpop.f32.mrb[2].mxu0  ;;  %v305_v22 = vmax.f32 %v296_v17, 0.0 }
 0x133   : > { %v1228_v21 = vmin.f32 %v304_v18, 6.0  ;;  %v300_v23 = vadd.f32 %v299_v20, %v213_v19  ;;  %v301_v24 = vpop.f32.mrb[3].mxu0 }
 0x134   : > { %v1232_v26 = vmin.f32 %v305_v22, 6.0  ;;  %v302_v28 = vadd.f32 %v301_v24, %v213_v19 }
 0x135   : > { %v306_v25 = vmax.f32 %v300_v23, 0.0  ;;  %344 = vrot.lane.b32.xlu0 %v1228_v21, %s1021_s18  ;;  %321 = vrot.lane.b32.xlu1 %v1228_v21, %s1022_s20  ;;  %v473_v23 = vmul.f32 %v467_v43, %v1228_v21 }
 0x136   : > { %v307_v29 = vmax.f32 %v302_v28, 0.0  ;;  %v386_v13 = vmul.f32 %v379_v38, %v1232_v26  ;;  %v474_v52 = vmul.f32 %v467_v43, %v1232_v26 }
 0x137   : > { %v1234_v27 = vmin.f32 %v306_v25, 6.0 }
 0x138   : > { %v1240_v30 = vmin.f32 %v307_v29, 6.0 }
 0x139   : > { %325 = vrot.lane.b32.xlu0 %v1232_v26, %s1022_s20  ;;  %323 = vrot.lane.b32.xlu1 %v1234_v27, %s1022_s20  ;;  %v387_v28 = vmul.f32 %v1254_v36, %v1234_v27  ;;  %v475_v43 = vmul.f32 %v1260_v44, %v1234_v27 }
 0x13a   : > { %v388_v53 = vmul.f32 %v1254_v36, %v1240_v30  ;;  %v476_v62 = vmul.f32 %v1260_v44, %v1240_v30 }
 0x13d   : > { %348 = vrot.lane.b32.xlu0 %v1232_v26, %s1021_s18  ;;  %346 = vrot.lane.b32.xlu1 %v1234_v27, %s1021_s18 }
 0x141   : > { %410 = vperm.xlu0 %868, %v1202_v4   ;;  %327 = vrot.lane.b32.xlu1 %v1240_v30, %s1022_s20 }
 0x145   : > { %871 = vset.pattern.permute.xlu0 %v1023_v31  ;;  %350 = vrot.lane.b32.xlu1 %v1240_v30, %s1021_s18 }
 0x146   : > { %426 = vperm.xlu0 %871, %v1212_v6  }
 0x149   : > { %414 = vperm.xlu1 %869, %v1212_v6  }
 0x14a   : > { %873 = vset.pattern.permute.xlu0 %v1024_v32 }
 0x14b   : > { %498 = vperm.xlu0 %873, %v1202_v4  }
 0x14d   : > { %870 = vset.pattern.permute.xlu1 %v1023_v31 }
 0x14e   : > { %422 = vperm.xlu1 %870, %v1202_v4  }
 0x152   : > { %872 = vset.pattern.permute.xlu1 %v1025_v33 }
 0x153   : > { %438 = vperm.xlu1 %872, %v1202_v4  }
 0x157   : > { %442 = vperm.xlu1 %872, %v1212_v6  }
 0x15b   : > { %874 = vset.pattern.permute.xlu1 %v1024_v32 }
 0x15c   : > { %502 = vperm.xlu1 %874, %v1212_v6   ;;  %v385_v6 = vmul.f32 %v379_v38, %v1228_v21 }
 0x1a7   : > { %v345_v50 = vpop.permute.xlu0 %344  ;;  %v322_v51 = vpop.permute.xlu1 %321 }
 0x1ab   : > { %v326_v54 = vpop.permute.xlu0 %325  ;;  %v324_v55 = vpop.permute.xlu1 %323 }
 0x1ac   : > { %v330_v57 = vsel %vm329_vm2, %v322_v51, %v326_v54  ;;  %v332_v58 = vsel %vm329_vm2, %v326_v54, %v322_v51 }
 0x1ad   : > { %v1286_v59 = vsel %vm1272_vm3, %v332_v58, 0.0  ;;  %v1300_v63 = vsel %vm1276_vm4, %v330_v57, 0.0 }
 0x1ae   : > { %v373_v60 = vmul.f32 %v367_v34, %v1286_v59  ;;  %v374_v9 = vmul.f32 %v367_v34, %v1300_v63  ;;  %v461_v19 = vmul.f32 %v455_v39, %v1286_v59  ;;  %v462_v34 = vmul.f32 %v455_v39, %v1300_v63 }
 0x1af   : > { %v349_v0 = vpop.permute.xlu0 %348  ;;  %v347_v1 = vpop.permute.xlu1 %346 }
 0x1b0   : > { %v353_v2 = vsel %vm352_vm5, %v345_v50, %v349_v0  ;;  %v355_v4 = vsel %vm352_vm5, %v349_v0, %v345_v50  ;;  %v389_v11 = vadd.f32 %v385_v6, %v373_v60  ;;  %v390_v22 = vadd.f32 %v386_v13, %v374_v9 }
 0x1b1   : > { %v1309_v7 = vsel %vm1290_vm6, %v353_v2, 0.0  ;;  %v1313_v8 = vsel %vm1294_vm7, %v355_v4, 0.0  ;;  %v477_v51 = vadd.f32 %v473_v23, %v461_v19  ;;  %v478_v58 = vadd.f32 %v474_v52, %v462_v34 }
 0x1b2   : > { %v401_v10 = vmul.f32 %v395_v37, %v1309_v7  ;;  %v402_v14 = vmul.f32 %v395_v37, %v1313_v8  ;;  %v489_v29 = vmul.f32 %v483_v46, %v1309_v7  ;;  %v490_v39 = vmul.f32 %v483_v46, %v1313_v8 }
 0x1b3   : > { %v328_v12 = vpop.permute.xlu1 %327 }
 0x1b4   : > { %v331_v15 = vsel %vm329_vm2, %v324_v55, %v328_v12  ;;  %v333_v16 = vsel %vm329_vm2, %v328_v12, %v324_v55  ;;  %v405_v17 = vadd.f32 %v401_v10, %v389_v11  ;;  %v406_v33 = vadd.f32 %v402_v14, %v390_v22 }
 0x1b5   : > { %v340_v18 = vsel %vm1272_vm3, %v333_v16, 0.0  ;;  %v341_v24 = vsel %vm1276_vm4, %v331_v15, 0.0  ;;  %v493_v56 = vadd.f32 %v489_v29, %v477_v51  ;;  %v494_v61 = vadd.f32 %v490_v39, %v478_v58 }
 0x1b6   : > { %v375_v20 = vmul.f32 %v1252_v35, %v340_v18  ;;  %511 = vrot.lane.b32.xlu1 %v405_v17, %s1026_s4  ;;  %v376_v42 = vmul.f32 %v1252_v35, %v341_v24  ;;  %v463_v57 = vmul.f32 %v1258_v41, %v340_v18  ;;  %v464_v46 = vmul.f32 %v1258_v41, %v341_v24  ;;  %v1364_v41 = vld [vmem:[%s1482_s2] sm:$0xf] }
 0x1b7   : > { %v351_v25 = vpop.permute.xlu1 %350  ;;  %v1028_v10 = vmov 16  }
 0x1b8   : > { %v354_v31 = vsel %vm352_vm5, %v347_v1, %v351_v25  ;;  %v356_v32 = vsel %vm352_vm5, %v351_v25, %v347_v1  ;;  %v391_v50 = vadd.f32 %v387_v28, %v375_v20  ;;  %v392_v35 = vadd.f32 %v388_v53, %v376_v42  ;;  %875 = vset.pattern.permute.xlu1 %v1028_v10 }
 0x1b9   : > { %v363_v37 = vsel %vm1290_vm6, %v354_v31, 0.0  ;;  %v364_v38 = vsel %vm1294_vm7, %v356_v32, 0.0  ;;  %v480_v2 = vadd.f32 %v476_v62, %v464_v46  ;;  %876 = vset.pattern.permute.xlu0 %v1028_v10 }
 0x1ba   : > { %v403_v49 = vmul.f32 %v1256_v40, %v363_v37  ;;  %515 = vrot.lane.b32.xlu1 %v406_v33, %s1026_s4  ;;  %v404_v54 = vmul.f32 %v1256_v40, %v364_v38  ;;  %v491_v60 = vmul.f32 %v1264_v47, %v363_v37  ;;  %v479_v40 = vadd.f32 %v475_v43, %v463_v57 }
 0x1bb   : > { %v492_v0 = vmul.f32 %v1264_v47, %v364_v38 }
 0x1bc   : > { %v407_v55 = vadd.f32 %v403_v49, %v391_v50  ;;  %v408_v36 = vadd.f32 %v404_v54, %v392_v35  ;;  %v495_v1 = vadd.f32 %v491_v60, %v479_v40 }
 0x1bd   : > { %v496_v6 = vadd.f32 %v492_v0, %v480_v2 }
 0x1be   : > { %513 = vrot.lane.b32.xlu0 %v407_v55, %s1026_s4  ;;  %538 = vrot.lane.b32.xlu1 %v493_v56, %s1027_s25 }
 0x1c0   : > { %v411_v9 = vpop.permute.xlu0 %410 }
 0x1c1   : > { %v417_v12 = vmul.f32 %v411_v9, %v1286_v59  ;;  %v418_v13 = vmul.f32 %v411_v9, %v1300_v63 }
 0x1c2   : > { %517 = vrot.lane.b32.xlu0 %v408_v36, %s1026_s4  ;;  %542 = vrot.lane.b32.xlu1 %v494_v61, %s1027_s25 }
 0x1c5   : > { %v427_v14 = vpop.permute.xlu0 %426 }
 0x1c6   : > { %540 = vrot.lane.b32.xlu0 %v495_v1, %s1027_s25  ;;  %574 = vperm.xlu1 %875, %v1364_v41   ;;  %v431_v25 = vmul.f32 %v427_v14, %v1234_v27 }
 0x1c8   : > { %v415_v4 = vpop.permute.xlu1 %414 }
 0x1c9   : > { %v419_v15 = vmul.f32 %v415_v4, %v340_v18  ;;  %v420_v16 = vmul.f32 %v415_v4, %v341_v24 }
 0x1ca   : > { %544 = vrot.lane.b32.xlu0 %v496_v6, %s1027_s25  ;;  %v499_v42 = vpop.permute.xlu0 %498 }
 0x1cb   : > { %v435_v59 = vadd.f32 %v431_v25, %v419_v15 }
 0x1cd   : > { %v423_v11 = vpop.permute.xlu1 %422 }
 0x1ce   : > { %v429_v44 = vmul.f32 %v423_v11, %v1228_v21  ;;  %v430_v47 = vmul.f32 %v423_v11, %v1232_v26  ;;  %v432_v21 = vmul.f32 %v427_v14, %v1240_v30 }
 0x1d0   : > { %v433_v19 = vadd.f32 %v429_v44, %v417_v12  ;;  %v434_v20 = vadd.f32 %v430_v47, %v418_v13  ;;  %v436_v31 = vadd.f32 %v432_v21, %v420_v16 }
 0x1d2   : > { %v439_v17 = vpop.permute.xlu1 %438 }
 0x1d3   : > { %v445_v22 = vmul.f32 %v439_v17, %v1309_v7  ;;  %v446_v23 = vmul.f32 %v439_v17, %v1313_v8  ;;  %v317_v7 = vshra.s32 %v1262_v45, 4  ;;  %v318_v8 = vshra.s32 %v1267_v48, 4 }
 0x1d5   : > { %v449_v28 = vadd.f32 %v445_v22, %v433_v19  ;;  %v450_v26 = vadd.f32 %v446_v23, %v434_v20  ;;  %vm1379_vm10 = vcmp.gt.s32.totalorder %v317_v7, 0  ;;  %vm1383_vm11 = vcmp.gt.s32.totalorder %v318_v8, 0 }
 0x1d6   : > { %v443_v29 = vpop.permute.xlu1 %442  ;;  %vm1391_vm12 = vcmp.lt.s32.totalorder %v317_v7, 15  ;;  %vm1395_vm13 = vcmp.lt.s32.totalorder %v318_v8, 15 }
 0x1d7   : > { %v447_v63 = vmul.f32 %v443_v29, %v363_v37  ;;  %v448_v32 = vmul.f32 %v443_v29, %v364_v38  ;;  %v505_v35 = vadd.f32 %v499_v42, %v449_v28  ;;  %v506_v58 = vadd.f32 %v499_v42, %v450_v26 }
 0x1d9   : > { %v451_v18 = vadd.f32 %v447_v63, %v435_v59  ;;  %v452_v24 = vadd.f32 %v448_v32, %v436_v31 }
 0x1db   : > { %v503_v33 = vpop.permute.xlu1 %502 }
 0x1dc   : > { %v507_v2 = vadd.f32 %v503_v33, %v451_v18  ;;  %v508_v4 = vadd.f32 %v503_v33, %v452_v24 }
 0x228   : > { %v512_v34 = vpop.permute.xlu1 %511 }
 0x22c   : > { %v516_v49 = vpop.permute.xlu1 %515 }
 0x22d   : > { %v520_v38 = vsel %vm519_vm8, %v512_v34, %v516_v49  ;;  %v522_v48 = vsel %vm519_vm8, %v516_v49, %v512_v34 }
 0x22e   : > { %v528_v56 = vsel %vm1379_vm10, %v522_v48, 0.0  ;;  %v529_v57 = vsel %vm1383_vm11, %v520_v38, 0.0 }
 0x22f   : > { %v532_v40 = vadd.f32 %v528_v56, %v505_v35  ;;  %v533_v62 = vadd.f32 %v529_v57, %v506_v58 }
 0x230   : > { %v514_v27 = vpop.permute.xlu0 %513  ;;  %v539_v30 = vpop.permute.xlu1 %538 }
 0x234   : > { %v518_v51 = vpop.permute.xlu0 %517  ;;  %v543_v52 = vpop.permute.xlu1 %542 }
 0x235   : > { %v547_v54 = vsel %vm546_vm9, %v539_v30, %v543_v52  ;;  %v549_v55 = vsel %vm546_vm9, %v543_v52, %v539_v30  ;;  %v521_v43 = vsel %vm519_vm8, %v514_v27, %v518_v51  ;;  %v523_v60 = vsel %vm519_vm8, %v518_v51, %v514_v27 }
 0x236   : > { %v555_v36 = vsel %vm1391_vm12, %v547_v54, 0.0  ;;  %v556_v61 = vsel %vm1395_vm13, %v549_v55, 0.0  ;;  %v530_v0 = vsel %vm1379_vm10, %v523_v60, 0.0  ;;  %v531_v1 = vsel %vm1383_vm11, %v521_v43, 0.0 }
 0x237   : > { %v559_v6 = vadd.f32 %v555_v36, %v532_v40  ;;  %v560_v9 = vadd.f32 %v556_v61, %v533_v62  ;;  %v534_v11 = vadd.f32 %v530_v0, %v507_v2  ;;  %v535_v44 = vadd.f32 %v531_v1, %v508_v4 }
 0x238   : > { %v541_v46 = vpop.permute.xlu0 %540 }
 0x239   : > { %v564_v17 = vmax.f32 %v560_v9, 0.0  ;;  %v563_v19 = vmax.f32 %v559_v6, 0.0 }
 0x23b   : > { %v568_v23 = vmin.f32 %v564_v17, 6.0  ;;  %v567_v21 = vmin.f32 %v563_v19, 6.0 }
 0x23c   : > { %v545_v10 = vpop.permute.xlu0 %544 }
 0x23d   : > { %v548_v47 = vsel %vm546_vm9, %v541_v46, %v545_v10  ;;  %v550_v12 = vsel %vm546_vm9, %v545_v10, %v541_v46 }
 0x23e   : > { %v557_v13 = vsel %vm1391_vm12, %v548_v47, 0.0  ;;  %v558_v14 = vsel %vm1395_vm13, %v550_v12, 0.0 }
 0x23f   : > { %v561_v15 = vadd.f32 %v557_v13, %v534_v11  ;;  %v562_v16 = vadd.f32 %v558_v14, %v535_v44 }
 0x241   : > { %v566_v20 = vmax.f32 %v562_v16, 0.0  ;;  %v565_v22 = vmax.f32 %v561_v15, 0.0 }
 0x243   : > { %v570_v25 = vmin.f32 %v566_v20, 6.0  ;;  %v569_v28 = vmin.f32 %v565_v22, 6.0 }
 0x245   : > { %v777_v45 = vpack.c.bf16 %v570_v25, %v568_v23  ;;  %v779_v26 = vpack.c.bf16 %v569_v28, %v567_v21  ;;  %v575_v29 = vpop.permute.xlu1 %574 }
 0x247   : > { %778 = vmatprep.subr.bf16.mxu1 %v777_v45 }
 0x248   : > { %780 = vmatpush1.bf16.msra.mxu1 %v779_v26 }
 0x24b   : > { %769 = vmatmul.mubr.msk.f32.vlgmr.msra.gmra.mrb[0].mxu1 %vm577_vm14, %v1364_v41 }
 0x31e   : > { %v646_v59 = vpop.f32.mrb[0].mxu1 }
 0x31f   : > { %v647_v31 = vadd.f32 %v646_v59, %v575_v29  ;;  %v648_v63 = vpop.f32.mrb[1].mxu1 }
 0x320   : > { %v649_v32 = vadd.f32 %v648_v63, %v575_v29 }
 0x321   : > { %v652_v18 = vadd.f32 %v647_v31, %v1200_v3 }
 0x322   : > { %v653_v24 = vadd.f32 %v649_v32, %v1206_v5 }
 0x324   : > { %v656_v33 = vcombine.low %v652_v18, %v653_v24 }
 0x326   : > { %658 = vst [vmem:[%s201_s9] sm:$0xff] %v656_v33 }
 0x327   : > { %949 = shalt.err (!%p946_p7)
}
 0x328   : > { %s950_s30 = scalar_lea.hbm %s1436_s28, 128  ;;  %s954_s20 = scalar_lea.hbm %s1483_s3, 256 }
 0x329   : > { %p951_p9 = scmp.ne.s32.totalorder %s1436_s28, %s950_s30  ;;  %p955_p0 = scmp.lt.u32.totalorder %s1436_s28, %s1483_s3 }
 0x32a   : > { %p956_p11 = scmp.lt.u32.totalorder %s954_s20, %s950_s30  ;;  %p958_p4 = scmp.lt.u32.totalorder %s950_s30, %s1436_s28 }
 0x32b   : > { %p952_p2 = pnand %p951_p9, %p1141_p12 }
 0x32c   : > { %p957_p1 = por %p956_p11, %p955_p0 }
 0x32d   : > { %p953_p5 = pneg %p952_p2 }
 0x32e   : > { %p959_p6 = por %p958_p4, %p957_p1 }
 0x330   : > { %p960_p8 = pnand %p959_p6, %p953_p5 }
 0x332   : > { %963 = shalt.err (!%p960_p8)
}
 0x333   : > { %787 = dma.vmem_to_hbm [thread:$0]  (%p1141_p12), %s1438_s10, 128, %s1436_s28, %s660_s29  }
 0x334 PF: > { %s686_s26 = sand.u32 1, %s994_s12   ;;  %p1514_p10 = scmp.ne.s32.totalorder %s1488_s19, 0 }
 0x335   : > { %p1515_p13 = scmp.ge.s32.totalorder %s1006_s15, 2  ;;  %s687_s5 = scalar_lea.sflag [#allocation4], %s686_s26 }
 0x337   : > { %p798_p3 = pnand %p1515_p13, %p1514_p10 }
 0x339   : > { %989 = dma.done.wait (!%p798_p3), %s687_s5, 128  }
 0x33a   : > { %991 = vsyncadd (!%p798_p3), %s687_s5, 4294967168  ;;  %p17_p7 = scmp.ge.s32.totalorder %s1106_s24, 4   ;;  %s1516_s12 = smov %s998_s13 }
 0x33b   : > { %s1517_s13 = smov %s1002_s14  ;;  %s1518_s14 = smov %s1137_s17 }
 0x33c   : > { %s1519_s15 = smov %s1106_s24  ;;  %19 = sbr.rel (!%p17_p7) target bundleno = 6 (0x6), region = 81 }
 0x343   :  { %692 = vsyncpa [#allocation3], 1 }
 0x344   :  { %694 = vsyncpa [#allocation3 + $0x1], 1 }
 0x345   :  { %695 = vsyncpa [#allocation6], 1 }
 0x346   :  { %696 = vsyncpa [#allocation4], 1 }
 0x347   :  { %698 = vsyncpa [#allocation4 + $0x1], 1 }

</bundles_post_ra>
